<compile_context>
chip_gen: v5e
topology: v5e:2x2
jax: 0.10.0
libtpu: 0.0.40
codegen_flags: <defaults>
</compile_context>

<pallas_src>
import functools
import math

import jax
import jax.numpy as jnp
from jax import lax
from jax.experimental import pallas as pl
from jax.experimental.pallas import tpu as pltpu


def _tdnn_kernel(x_ref, w_ref, shift_ref, o_ref, *,
                 kernel_size, dilation, out_len, b_tile):
    # x_ref:     (B_tile, C_in, L_pad)   bf16, padded time axis (multiple of 128)
    # w_ref:     (C_out, K*C_in)         bf16, BN scale folded in, tap-major cols
    # shift_ref: (C_out, 1)              f32 folded BN shift
    # o_ref:     (B_tile, C_out, out_len)
    cols = []
    for b in range(b_tile):                       # static, fully unrolled
        xb = x_ref[b]                             # (C_in, L_pad) load once
        taps = [xb[:, k * dilation: k * dilation + out_len]
                for k in range(kernel_size)]      # K shifted (C_in, out_len) views
        cols.append(jnp.concatenate(taps, axis=0))            # (K*C_in, out_len)
    # Batch elements concatenated along the lane axis -> one big matmul N dim.
    xs = cols[0] if b_tile == 1 else jnp.concatenate(cols, axis=1)
    # Single fused MXU matmul, contraction = K*C_in, f32 accumulation.
    acc = jnp.dot(w_ref[...], xs, preferred_element_type=jnp.float32)
    # Fused BatchNorm shift + ReLU epilogue (scale already folded into weights).
    y = jnp.maximum(acc + shift_ref[...], 0.0)
    for b in range(b_tile):
        o_ref[b] = y[:, b * out_len:(b + 1) * out_len].astype(o_ref.dtype)


def tdnn_layer(x, weight, bn_gamma, bn_beta, bn_mean, bn_var, *,
               stride=1, padding=-1, dilation=1, bias=None, eps=1e-5,
               b_tile=None):
    """TDNNLayer forward: Conv1d -> BatchNorm1d (eval) -> ReLU.

    x:       (B, C_in, L)      float32
    weight:  (C_out, C_in, K)  Conv1d weight (PyTorch layout)
    bn_*:    (C_out,)          BatchNorm1d affine params / running stats
    bias:    optional (C_out,) conv bias (module default is bias=False)
    """
    B, C_in, L = x.shape
    C_out, C_in_w, K = weight.shape
    assert C_in_w == C_in
    if padding < 0:
        assert K % 2 == 1, "negative padding requires odd kernel size"
        padding = (K - 1) // 2 * dilation

    L_pad_logical = L + 2 * padding
    L1 = L_pad_logical - (K - 1) * dilation        # stride-1 output length
    assert L1 >= 1

    # Pad the time axis once: conv padding + round up to a multiple of 128 so
    # every x row is lane-dense (unmasked DMA/loads). Cast to bf16 for the MXU.
    L_pad = ((L_pad_logical + 127) // 128) * 128
    x_pad = jnp.pad(x.astype(jnp.bfloat16),
                    ((0, 0), (0, 0), (padding, padding + L_pad - L_pad_logical)))

    # Fold BatchNorm (eval) + optional conv bias:  y = (scale*W) @ x + shift.
    scale = bn_gamma / jnp.sqrt(bn_var + eps)                        # (C_out,)
    b0 = jnp.zeros((C_out,), jnp.float32) if bias is None else bias.astype(jnp.float32)
    shift = (bn_beta + (b0 - bn_mean) * scale).reshape(C_out, 1).astype(jnp.float32)

    # Scale-folded, tap-major weight: column j = k*C_in + c  ->  W[o, c, k].
    w_fused = weight.astype(jnp.float32) * scale[:, None, None]      # (C_out, C_in, K)
    w_fused = jnp.transpose(w_fused, (0, 2, 1)).reshape(C_out, K * C_in)
    w_fused = w_fused.astype(jnp.bfloat16)

    # Batch tile: amortize per-grid-step overhead; target >=256..512 matmul lanes.
    if b_tile is None:
        b_tile = min(B, max(1, 512 // max(L1, 1)))
    while B % b_tile:
        b_tile -= 1

    kernel = functools.partial(_tdnn_kernel, kernel_size=K, dilation=dilation,
                               out_len=L1, b_tile=b_tile)

    out1 = pl.pallas_call(
        kernel,
        out_shape=jax.ShapeDtypeStruct((B, C_out, L1), x.dtype),
        grid_spec=pltpu.PrefetchScalarGridSpec(
            num_scalar_prefetch=0,
            grid=(B // b_tile,),
            in_specs=[
                pl.BlockSpec((b_tile, C_in, L_pad), lambda i: (i, 0, 0)),
                pl.BlockSpec((C_out, K * C_in), lambda i: (0, 0)),
                pl.BlockSpec((C_out, 1), lambda i: (0, 0)),
            ],
            out_specs=pl.BlockSpec((b_tile, C_out, L1), lambda i: (i, 0, 0)),
        ),
        compiler_params=pltpu.CompilerParams(
            dimension_semantics=("parallel",)),
    )(x_pad, w_fused, shift)

    if stride > 1:
        # Conv stride == subsampling the stride-1 conv output (exact).
        # TODO(synk): move the stride into the kernel (strided lane slices) to
        # avoid computing/storing the discarded columns.
        out1 = out1[:, :, ::stride]
    return out1


def tdnn_layer_ref(x, weight, bn_gamma, bn_beta, bn_mean, bn_var, *,
                   stride=1, padding=-1, dilation=1, bias=None, eps=1e-5):
    """Pure-JAX reference matching the PyTorch forward (eval-mode BN)."""
    C_out, _, K = weight.shape
    if padding < 0:
        padding = (K - 1) // 2 * dilation
    y = lax.conv_general_dilated(
        x, weight,
        window_strides=(stride,),
        padding=[(padding, padding)],
        rhs_dilation=(dilation,),
        dimension_numbers=('NCH', 'OIH', 'NCH'),
        precision=lax.Precision.HIGHEST)
    if bias is not None:
        y = y + bias[None, :, None]
    y = (y - bn_mean[None, :, None]) / jnp.sqrt(bn_var[None, :, None] + eps)
    y = y * bn_gamma[None, :, None] + bn_beta[None, :, None]
    return jnp.maximum(y, 0.0)


if __name__ == "__main__":
    # Small shapes consistent with the module; L chosen so the output time
    # axis is a full 128-lane vreg and B_tile*L_out = 256 matmul lanes/step.
    B, C_in, C_out, K, L = 2, 32, 32, 5, 128
    dilation, stride, padding = 2, 1, -1   # padding=-1 -> "same"-style padding

    key = jax.random.PRNGKey(0)
    kx, kw, kg, kb, km, kv = jax.random.split(key, 6)

    x = jax.random.normal(kx, (B, C_in, L), dtype=jnp.float32)

    bound = 1.0 / math.sqrt(C_in * K)      # Conv1d default init range
    weight = jax.random.uniform(kw, (C_out, C_in, K),
                                minval=-bound, maxval=bound, dtype=jnp.float32)
    bn_gamma = jax.random.uniform(kg, (C_out,), minval=0.5, maxval=1.5,
                                  dtype=jnp.float32)
    bn_beta = 0.1 * jax.random.normal(kb, (C_out,), dtype=jnp.float32)
    bn_mean = 0.1 * jax.random.normal(km, (C_out,), dtype=jnp.float32)
    bn_var = jax.random.uniform(kv, (C_out,), minval=0.5, maxval=1.5,
                                dtype=jnp.float32)

    out = tdnn_layer(x, weight, bn_gamma, bn_beta, bn_mean, bn_var,
                     stride=stride, padding=padding, dilation=dilation)
    out = jax.block_until_ready(out)

    ref = tdnn_layer_ref(x, weight, bn_gamma, bn_beta, bn_mean, bn_var,
                         stride=stride, padding=padding, dilation=dilation)

    assert out.shape == ref.shape == (B, C_out, L), (out.shape, ref.shape)
    # bf16 MXU operands vs f32 reference -> slightly looser tolerance.
    assert jnp.allclose(out, ref, atol=2e-2, rtol=2e-2), "mismatch vs reference"

    print("KERNEL_OK")
</pallas_src>

<mosaic_0001>
module attributes {stable_mosaic.version = 11 : i64} {
  func.func @_tdnn_kernel(%arg0: i32, %arg1: memref<2x32x256xbf16, #tpu.memory_space<vmem>>, %arg2: memref<32x160xbf16, #tpu.memory_space<vmem>>, %arg3: memref<32x1xf32, #tpu.memory_space<vmem>>, %arg4: memref<2x32x128xf32, #tpu.memory_space<vmem>>) attributes {dimension_semantics = [#tpu.dimension_semantics<parallel>], iteration_bounds = array<i64: 1>, scalar_prefetch = 0 : i64, scratch_operands = 0 : i64, tpu.core_type = #tpu.core_type<tc>, window_params = [{transform_indices = @transform_0, window_bounds = array<i64: 2, 32, 256>}, {pipeline_mode = #tpu.pipeline_mode<synchronous>, transform_indices = @transform_1, window_bounds = array<i64: 32, 160>}, {pipeline_mode = #tpu.pipeline_mode<synchronous>, transform_indices = @transform_2, window_bounds = array<i64: 32, 1>}, {transform_indices = @transform_3, window_bounds = array<i64: 2, 32, 128>}]} {
    %c0 = arith.constant 0 : index
    %c0_0 = arith.constant 0 : index
    %c0_1 = arith.constant 0 : index
    %0 = vector.load %arg1[%c0, %c0_0, %c0_1] : memref<2x32x256xbf16, #tpu.memory_space<vmem>>, vector<1x32x256xbf16>
    %1 = vector.shape_cast %0 : vector<1x32x256xbf16> to vector<32x256xbf16>
    %2 = vector.extract_strided_slice %1 {offsets = [0, 0], sizes = [32, 128], strides = [1, 1]} : vector<32x256xbf16> to vector<32x128xbf16>
    %3 = vector.extract_strided_slice %1 {offsets = [0, 2], sizes = [32, 128], strides = [1, 1]} : vector<32x256xbf16> to vector<32x128xbf16>
    %4 = vector.extract_strided_slice %1 {offsets = [0, 4], sizes = [32, 128], strides = [1, 1]} : vector<32x256xbf16> to vector<32x128xbf16>
    %5 = vector.extract_strided_slice %1 {offsets = [0, 6], sizes = [32, 128], strides = [1, 1]} : vector<32x256xbf16> to vector<32x128xbf16>
    %6 = vector.extract_strided_slice %1 {offsets = [0, 8], sizes = [32, 128], strides = [1, 1]} : vector<32x256xbf16> to vector<32x128xbf16>
    %7 = tpu.concatenate %2, %3, %4, %5, %6 in 0 : vector<32x128xbf16>, vector<32x128xbf16>, vector<32x128xbf16>, vector<32x128xbf16>, vector<32x128xbf16> -> vector<160x128xbf16>
    %c1 = arith.constant 1 : index
    %c0_2 = arith.constant 0 : index
    %c0_3 = arith.constant 0 : index
    %8 = vector.load %arg1[%c1, %c0_2, %c0_3] : memref<2x32x256xbf16, #tpu.memory_space<vmem>>, vector<1x32x256xbf16>
    %9 = vector.shape_cast %8 : vector<1x32x256xbf16> to vector<32x256xbf16>
    %10 = vector.extract_strided_slice %9 {offsets = [0, 0], sizes = [32, 128], strides = [1, 1]} : vector<32x256xbf16> to vector<32x128xbf16>
    %11 = vector.extract_strided_slice %9 {offsets = [0, 2], sizes = [32, 128], strides = [1, 1]} : vector<32x256xbf16> to vector<32x128xbf16>
    %12 = vector.extract_strided_slice %9 {offsets = [0, 4], sizes = [32, 128], strides = [1, 1]} : vector<32x256xbf16> to vector<32x128xbf16>
    %13 = vector.extract_strided_slice %9 {offsets = [0, 6], sizes = [32, 128], strides = [1, 1]} : vector<32x256xbf16> to vector<32x128xbf16>
    %14 = vector.extract_strided_slice %9 {offsets = [0, 8], sizes = [32, 128], strides = [1, 1]} : vector<32x256xbf16> to vector<32x128xbf16>
    %15 = tpu.concatenate %10, %11, %12, %13, %14 in 0 : vector<32x128xbf16>, vector<32x128xbf16>, vector<32x128xbf16>, vector<32x128xbf16>, vector<32x128xbf16> -> vector<160x128xbf16>
    %16 = tpu.concatenate %7, %15 in 1 : vector<160x128xbf16>, vector<160x128xbf16> -> vector<160x256xbf16>
    %c0_4 = arith.constant 0 : index
    %c0_5 = arith.constant 0 : index
    %17 = vector.load %arg2[%c0_4, %c0_5] : memref<32x160xbf16, #tpu.memory_space<vmem>>, vector<32x160xbf16>
    %cst = arith.constant dense<0.000000e+00> : vector<32x256xf32>
    %18 = tpu.matmul %17, %16, %cst {dimension_numbers = #tpu.dot_dimension_numbers<[1], [0], [0], [1], [0, 0, 1, 1], [], []>} : vector<32x160xbf16>, vector<160x256xbf16>, vector<32x256xf32> -> vector<32x256xf32>
    %c0_6 = arith.constant 0 : index
    %c0_7 = arith.constant 0 : index
    %19 = vector.load %arg3[%c0_6, %c0_7] : memref<32x1xf32, #tpu.memory_space<vmem>>, vector<32x1xf32>
    %20 = vector.broadcast %19 : vector<32x1xf32> to vector<32x256xf32>
    %21 = arith.addf %18, %20 : vector<32x256xf32>
    %cst_8 = arith.constant 0.000000e+00 : f32
    %22 = vector.broadcast %cst_8 : f32 to vector<32x256xf32>
    %23 = arith.maximumf %21, %22 : vector<32x256xf32>
    %24 = vector.extract_strided_slice %23 {offsets = [0, 0], sizes = [32, 128], strides = [1, 1]} : vector<32x256xf32> to vector<32x128xf32>
    %c0_9 = arith.constant 0 : index
    %c0_10 = arith.constant 0 : index
    %c0_11 = arith.constant 0 : index
    %25 = vector.load %arg4[%c0_9, %c0_10, %c0_11] : memref<2x32x128xf32, #tpu.memory_space<vmem>>, vector<1x32x128xf32>
    %26 = vector.shape_cast %25 : vector<1x32x128xf32> to vector<32x128xf32>
    %27 = vector.shape_cast %24 : vector<32x128xf32> to vector<1x32x128xf32>
    tpu.vector_store %arg4[%c0_9, %c0_10, %c0_11], %27 {strides = array<i32>} : memref<2x32x128xf32, #tpu.memory_space<vmem>>, vector<1x32x128xf32>,
    %28 = vector.extract_strided_slice %23 {offsets = [0, 128], sizes = [32, 128], strides = [1, 1]} : vector<32x256xf32> to vector<32x128xf32>
    %c1_12 = arith.constant 1 : index
    %c0_13 = arith.constant 0 : index
    %c0_14 = arith.constant 0 : index
    %29 = vector.load %arg4[%c1_12, %c0_13, %c0_14] : memref<2x32x128xf32, #tpu.memory_space<vmem>>, vector<1x32x128xf32>
    %30 = vector.shape_cast %29 : vector<1x32x128xf32> to vector<32x128xf32>
    %31 = vector.shape_cast %28 : vector<32x128xf32> to vector<1x32x128xf32>
    tpu.vector_store %arg4[%c1_12, %c0_13, %c0_14], %31 {strides = array<i32>} : memref<2x32x128xf32, #tpu.memory_space<vmem>>, vector<1x32x128xf32>,
    return
  }
  func.func @transform_0(%arg0: i32) -> (i32, i32, i32) {
    %c0_i32 = arith.constant 0 : i32
    %c0_i32_0 = arith.constant 0 : i32
    %c0_i32_1 = arith.constant 0 : i32
    return %arg0, %c0_i32, %c0_i32_0 : i32, i32, i32
  }
  func.func @transform_1(%arg0: i32) -> (i32, i32) {
    %c0_i32 = arith.constant 0 : i32
    %c0_i32_0 = arith.constant 0 : i32
    %c0_i32_1 = arith.constant 0 : i32
    return %c0_i32, %c0_i32_0 : i32, i32
  }
  func.func @transform_2(%arg0: i32) -> (i32, i32) {
    %c0_i32 = arith.constant 0 : i32
    %c0_i32_0 = arith.constant 0 : i32
    %c0_i32_1 = arith.constant 0 : i32
    return %c0_i32, %c0_i32_0 : i32, i32
  }
  func.func @transform_3(%arg0: i32) -> (i32, i32, i32) {
    %c0_i32 = arith.constant 0 : i32
    %c0_i32_0 = arith.constant 0 : i32
    %c0_i32_1 = arith.constant 0 : i32
    return %arg0, %c0_i32, %c0_i32_0 : i32, i32, i32
  }
}

</mosaic_0001>

<bundles_post_ra>
// kernel: tpu_custom_call.1
= control target key start
LH: loop header
LB: loop body
LE: loop exit
PB: predicated region body
PF: predicated region fallthrough
CT: control target
= control target key end

     0   :  { %8 = vsyncpa [#allocation3], 0  ;;  %s595_s0 = inlined_call_operand.hbm [shape: bf16[2,32,256], index: 0, kind: input, shape index: {}]   ;;  %s596_s1 = inlined_call_operand.vmem [shape: bf16[32,160], index: 1, kind: input, shape index: {}]   ;;  %s597_s2 = inlined_call_operand.vmem [shape: f32[32,1], index: 2, kind: input, shape index: {}]   ;;  %s598_s3 = inlined_call_operand.hbm [shape: f32[2,32,128], index: 3, kind: output, shape index: {}]  }
   0x1   :  { %9 = vsyncpa [#allocation4], 0  ;;  %s14_s14 = sshll.u32 %s595_s0, 4  ;;  %s470_s15 = smov [#allocation2]   ;;  %s15_s14 = int_to_ptr.hbm [resolvable:$true] %s14_s14 }
   0x2   :  { %s16_s16 = sshll.u32 %s470_s15, 4  ;;  %s471_s17 = smov 128   ;;  %s17_s16 = int_to_ptr.vmem [resolvable:$true] %s16_s16 }
   0x3   :  { %s472_s18 = smov 8  }
   0x4   :  { %22 = dma.hbm_to_vmem [thread:$0]  %s15_s14, 1024, %s17_s16, [#allocation3], %s471_s17, %s471_s17, %s472_s18  }
   0x5   :  { %466 = dma.done.wait [#allocation3], 1024  }
   0x6   :  { %467 = vsyncadd [#allocation3], 4294966272  ;;  %v364_v0 = vld [vmem:[#allocation2 + $0x30] sm:$0xf]  ;;  %v401_v1 = vld [vmem:[#allocation2 + $0x34] sm:$0xf0] }
   0x7   :  { %v360_v2 = vld [vmem:[#allocation2 + $0x20] sm:$0xf]  ;;  %v505_v3 = vor.u32 %v401_v1, %v364_v0  ;;  %v399_v4 = vld [vmem:[#allocation2 + $0x24] sm:$0xf0]  ;;  %v348_v6 = vld [vmem:[#allocation2 + $0x10] sm:$0xf] }
   0x8   :  { %v507_v5 = vor.u32 %v399_v4, %v360_v2  ;;  %s473_s0 = smov 122   ;;  %v397_v7 = vld [vmem:[#allocation2 + $0x14] sm:$0xf0]  ;;  %v400_v8 = vld [vmem:[#allocation2 + $0x34] sm:$0xf]  ;;  %s474_s19 = smov 124  }
   0x9   :  { %157 = vrot.lane.b32.xlu0 %v505_v3, %s473_s0  ;;  %v370_v9 = vld [vmem:[#allocation2 + $0x38] sm:$0xf0]  ;;  %v511_v10 = vor.u32 %v397_v7, %v348_v6  ;;  %v398_v11 = vld [vmem:[#allocation2 + $0x24] sm:$0xf]  ;;  %v366_v12 = vld [vmem:[#allocation2 + $0x28] sm:$0xf0] }
   0xa   :  { %153 = vrot.lane.b32.xlu1 %v507_v5, %s473_s0  ;;  %v373_v13 = vor.u32 %v400_v8, %v370_v9  ;;  %v396_v14 = vld [vmem:[#allocation2 + $0x14] sm:$0xf]  ;;  %v354_v15 = vld [vmem:[#allocation2 + $0x18] sm:$0xf0]  ;;  %v369_v16 = vor.u32 %v398_v11, %v366_v12  ;;  %v344_v18 = vld [vmem:[#allocation2] sm:$0xf] }
   0xb   :  { %84 = vrot.lane.b32.xlu2 %v511_v10, %s473_s0  ;;  %v357_v17 = vor.u32 %v396_v14, %v354_v15  ;;  %v395_v19 = vld [vmem:[#allocation2 + $0x4] sm:$0xf0]  ;;  %v394_v21 = vld [vmem:[#allocation2 + $0x4] sm:$0xf]  ;;  %v350_v22 = vld [vmem:[#allocation2 + $0x8] sm:$0xf0] }
   0xc   :  { %v514_v20 = vor.u32 %v395_v19, %v344_v18  ;;  %v353_v23 = vor.u32 %v394_v21, %v350_v22  ;;  %s475_s20 = smov 126   ;;  %s476_s21 = smov 120   ;;  %vm88_vm0 = vcmask 998400   ;;  %vm75_vm1 = vcmask 1014784   ;;  %v376_v56 = vld [vmem:[%s596_s1] sm:$0xf] }
   0xd   :  { %vm62_vm2 = vcmask 1031168   ;;  %v403_v57 = vld [vmem:[%s596_s1 + $0x4] sm:$0xf0]  ;;  %v477_v62 = vmov 0   ;;  %vm101_vm3 = vcmask 982016   ;;  %v183_v7 = vld [vmem:[%s597_s2 + $0x10] sm:$0xff] }
   0xe   :  { %v377_v61 = vor.u32 %v403_v57, %v376_v56  ;;  %416 = vset.pattern.permute.xlu0 %v477_v62  ;;  %417 = vset.pattern.permute.xlu1 %v477_v62  ;;  %v182_v1 = vld [vmem:[%s597_s2 + $0x8] sm:$0xff]  ;;  %v181_v8 = vld [vmem:[%s597_s2] sm:$0xff]  ;;  %v405_v11 = vld [vmem:[%s596_s1 + $0x14] sm:$0xf0]  ;;  %vm223_vm4 = vcmask 261120   ;;  %s329_s22 = sshll.u32 %s598_s3, 4  ;;  %s330_s22 = int_to_ptr.hbm [resolvable:$true] %s329_s22 }
   0xf   :  { %415 = vset.pattern.permute.xlu2 %v477_v62  ;;  %v378_v6 = vld [vmem:[%s596_s1 + $0x8] sm:$0xf0]  ;;  %v184_v18 = vld [vmem:[%s597_s2 + $0x18] sm:$0xff]  ;;  %v404_v22 = vld [vmem:[%s596_s1 + $0x14] sm:$0xf] }
  0x11   :  { %159 = vrot.lane.b32.xlu0 %v373_v13, %s473_s0 }
  0x12   :  { %155 = vrot.lane.b32.xlu1 %v369_v16, %s473_s0 }
  0x13   :  { %86 = vrot.lane.b32.xlu2 %v357_v17, %s473_s0 }
  0x19   :  { %145 = vrot.lane.b32.xlu0 %v505_v3, %s474_s19 }
  0x1a   :  { %147 = vrot.lane.b32.xlu1 %v373_v13, %s474_s19 }
  0x1b   :  { %80 = vrot.lane.b32.xlu2 %v514_v20, %s473_s0 }
  0x21   :  { %82 = vrot.lane.b32.xlu0 %v353_v23, %s473_s0 }
  0x22   :  { %141 = vrot.lane.b32.xlu1 %v507_v5, %s474_s19 }
  0x23   :  { %143 = vrot.lane.b32.xlu2 %v369_v16, %s474_s19 }
  0x29   :  { %71 = vrot.lane.b32.xlu0 %v511_v10, %s474_s19 }
  0x2a   :  { %73 = vrot.lane.b32.xlu1 %v357_v17, %s474_s19 }
  0x2b   :  { %133 = vrot.lane.b32.xlu2 %v505_v3, %s475_s20 }
  0x31   :  { %135 = vrot.lane.b32.xlu0 %v373_v13, %s475_s20 }
  0x32   :  { %67 = vrot.lane.b32.xlu1 %v514_v20, %s474_s19 }
  0x33   :  { %69 = vrot.lane.b32.xlu2 %v353_v23, %s474_s19 }
  0x39   :  { %129 = vrot.lane.b32.xlu0 %v507_v5, %s475_s20 }
  0x3a   :  { %131 = vrot.lane.b32.xlu1 %v369_v16, %s475_s20 }
  0x3b   :  { %58 = vrot.lane.b32.xlu2 %v511_v10, %s475_s20 }
  0x41   :  { %60 = vrot.lane.b32.xlu0 %v357_v17, %s475_s20 }
  0x42   :  { %54 = vrot.lane.b32.xlu1 %v514_v20, %s475_s20 }
  0x43   :  { %56 = vrot.lane.b32.xlu2 %v353_v23, %s475_s20 }
  0x49   :  { %169 = vrot.lane.b32.xlu0 %v505_v3, %s476_s21 }
  0x4a   :  { %171 = vrot.lane.b32.xlu1 %v373_v13, %s476_s21 }
  0x4b   :  { %165 = vrot.lane.b32.xlu2 %v507_v5, %s476_s21 }
  0x51   :  { %167 = vrot.lane.b32.xlu0 %v369_v16, %s476_s21 }
  0x52   :  { %97 = vrot.lane.b32.xlu1 %v511_v10, %s476_s21 }
  0x53   :  { %99 = vrot.lane.b32.xlu2 %v357_v17, %s476_s21 }
  0x59   :  { %93 = vrot.lane.b32.xlu0 %v514_v20, %s476_s21 }
  0x5a   :  { %95 = vrot.lane.b32.xlu1 %v353_v23, %s476_s21  ;;  %v386_v23 = vld [vmem:[%s596_s1 + $0x18] sm:$0xf0] }
  0x5b   :  { %187 = vperm.xlu2 %415, %v181_v8  }
  0x61   :  { %192 = vperm.xlu0 %416, %v182_v1  }
  0x62   :  { %197 = vperm.xlu1 %417, %v183_v7  }
  0x63   :  { %202 = vperm.xlu2 %415, %v184_v18  }
  0x65   :  { %v85_v24 = vpop.permute.xlu2 %84 }
  0x6d   :  { %v87_v25 = vpop.permute.xlu2 %86 }
  0x6e   :  { %v90_v26 = vsel %vm88_vm0, %v85_v24, %v87_v25  ;;  %v389_v24 = vor.u32 %v404_v22, %v386_v23 }
  0x6f   :  { %230 = vmatpush.bf16.msra.mxu0 %v90_v26 }
  0x75   :  { %v81_v29 = vpop.permute.xlu2 %80 }
  0x7b   :  { %v158_v27 = vpop.permute.xlu0 %157 }
  0x7c   :  { %v154_v28 = vpop.permute.xlu1 %153 }
  0x7d   :  { %v144_v33 = vpop.permute.xlu2 %143 }
  0x83   :  { %v160_v30 = vpop.permute.xlu0 %159 }
  0x84   :  { %v156_v31 = vpop.permute.xlu1 %155  ;;  %v162_v32 = vsel %vm88_vm0, %v158_v27, %v160_v30 }
  0x85   :  { %268 = vmatpush.bf16.msra.mxu2 %v162_v32  ;;  %v161_v34 = vsel %vm88_vm0, %v154_v28, %v156_v31  ;;  %v134_v38 = vpop.permute.xlu2 %133 }
  0x89   :  { %269 = vmatpush.bf16.msra.mxu2 %v161_v34 }
  0x8b   :  { %v146_v35 = vpop.permute.xlu0 %145 }
  0x8c   :  { %v148_v36 = vpop.permute.xlu1 %147 }
  0x8d   :  { %v150_v37 = vsel %vm75_vm1, %v146_v35, %v148_v36  ;;  %v70_v43 = vpop.permute.xlu2 %69 }
  0x8e   :  { %270 = vmatpush.bf16.msra.mxu2 %v150_v37 }
  0x93   :  { %v83_v39 = vpop.permute.xlu0 %82 }
  0x94   :  { %v142_v40 = vpop.permute.xlu1 %141  ;;  %v89_v41 = vsel %vm88_vm0, %v81_v29, %v83_v39 }
  0x95   :  { %231 = vmatpush.bf16.msra.mxu0 %v89_v41  ;;  %v149_v42 = vsel %vm75_vm1, %v142_v40, %v144_v33  ;;  %v59_v50 = vpop.permute.xlu2 %58 }
  0x96   :  { %271 = vmatpush.bf16.msra.mxu2 %v149_v42 }
  0x9b   :  { %v72_v44 = vpop.permute.xlu0 %71 }
  0x9c   :  { %v74_v45 = vpop.permute.xlu1 %73 }
  0x9d   :  { %v77_v46 = vsel %vm75_vm1, %v72_v44, %v74_v45  ;;  %v57_v55 = vpop.permute.xlu2 %56 }
  0x9e   :  { %232 = vmatpush.bf16.msra.mxu0 %v77_v46 }
  0xa3   :  { %v136_v47 = vpop.permute.xlu0 %135 }
  0xa4   :  { %v68_v48 = vpop.permute.xlu1 %67  ;;  %v138_v49 = vsel %vm62_vm2, %v134_v38, %v136_v47 }
  0xa5   :  { %v76_v51 = vsel %vm75_vm1, %v68_v48, %v70_v43  ;;  %272 = vmatpush.bf16.msra.mxu2 %v138_v49  ;;  %v166_v0 = vpop.permute.xlu2 %165 }
  0xa6   :  { %233 = vmatpush.bf16.msra.mxu0 %v76_v51 }
  0xab   :  { %v130_v52 = vpop.permute.xlu0 %129 }
  0xac   :  { %v132_v53 = vpop.permute.xlu1 %131 }
  0xad   :  { %v137_v54 = vsel %vm62_vm2, %v130_v52, %v132_v53  ;;  %v100_v9 = vpop.permute.xlu2 %99 }
  0xae   :  { %273 = vmatpush.bf16.msra.mxu2 %v137_v54 }
  0xb2   :  { %274 = vmatpush.bf16.msra.mxu2 %v505_v3 }
  0xb3   :  { %v61_v58 = vpop.permute.xlu0 %60 }
  0xb4   :  { %v55_v59 = vpop.permute.xlu1 %54  ;;  %v64_v60 = vsel %vm62_vm2, %v59_v50, %v61_v58 }
  0xb5   :  { %234 = vmatpush.bf16.msra.mxu0 %v64_v60  ;;  %v63_v63 = vsel %vm62_vm2, %v55_v59, %v57_v55  ;;  %v188_v27 = vpop.permute.xlu2 %187 }
  0xb6   :  { %275 = vmatpush.bf16.msra.mxu2 %v507_v5  ;;  %v402_v5 = vld [vmem:[%s596_s1 + $0x4] sm:$0xf] }
  0xb7   :  { %v381_v15 = vor.u32 %v402_v5, %v378_v6 }
  0xb9   :  { %235 = vmatpush.bf16.msra.mxu0 %v63_v63  ;;  %276 = vmatmul.bf16.vlgmr.msra.gmra.mxu2 %v377_v61 }
  0xbb   :  { %v170_v2 = vpop.permute.xlu0 %169 }
  0xbc   :  { %v172_v3 = vpop.permute.xlu1 %171 }
  0xbd   :  { %v174_v4 = vsel %vm101_vm3, %v170_v2, %v172_v3  ;;  %236 = vmatpush.bf16.msra.mxu0 %v511_v10  ;;  %v384_v10 = vld [vmem:[%s596_s1 + $0x10] sm:$0xf]  ;;  %v203_v56 = vpop.permute.xlu2 %202  ;;  %s478_s1 = smov [#allocation5]  }
  0xbe   :  { %293 = vmatpush.bf16.msra.mxu3 %v174_v4  ;;  %v385_v17 = vor.u32 %v405_v11, %v384_v10  ;;  %s327_s2 = sshll.u32 %s478_s1, 4  ;;  %s328_s2 = int_to_ptr.vmem [resolvable:$true] %s327_s2 }
  0xc1   :  { %237 = vmatpush.bf16.msra.mxu0 %v514_v20 }
  0xc3   :  { %v168_v12 = vpop.permute.xlu0 %167 }
  0xc4   :  { %v98_v13 = vpop.permute.xlu1 %97  ;;  %v173_v14 = vsel %vm101_vm3, %v166_v0, %v168_v12  ;;  %238 = vmatmul.bf16.vlgmr.msra.gmra.mxu0 %v377_v61 }
  0xc5   :  { %v103_v16 = vsel %vm101_vm3, %v98_v13, %v100_v9  ;;  %294 = vmatpush.bf16.msra.mxu3 %v173_v14 }
  0xc6   :  { %255 = vmatpush.bf16.msra.mxu1 %v103_v16 }
  0xc8   :  { %392 = vmatmul.msk.bf16.vlgmr.msra.gmra.mxu3 %vm223_vm4, %v381_v15 }
  0xc9   :  { %281 = vmatmul.bf16.gmra.mxu2 %v385_v17 }
  0xcb   :  { %v94_v19 = vpop.permute.xlu0 %93 }
  0xcc   :  { %v96_v20 = vpop.permute.xlu1 %95 }
  0xcd   :  { %v102_v21 = vsel %vm101_vm3, %v94_v19, %v96_v20 }
  0xce   :  { %256 = vmatpush.bf16.msra.mxu1 %v102_v21 }
  0xd1   :  { %390 = vmatmul.msk.bf16.vlgmr.msra.gmra.mxu1 %vm223_vm4, %v381_v15 }
  0xd3   :  { %v193_v36 = vpop.permute.xlu0 %192 }
  0xd4   :  { %243 = vmatmul.bf16.gmra.mxu0 %v385_v17  ;;  %v198_v44 = vpop.permute.xlu1 %197 }
  0xd8   :  { %393 = vmatmul.msk.bf16.gmra.mxu3 %vm223_vm4, %v389_v24 }
  0xe1   :  { %391 = vmatmul.msk.bf16.gmra.mxu1 %vm223_vm4, %v389_v24 }
 0x13c   :  { %v277_v25 = vpop.f32.mrf.mxu2 }
 0x13d   :  { %v278_v28 = vadd.f32 %v277_v25, %v188_v27 }
 0x141   :  { %v239_v26 = vpop.f32.mrf.mxu0 }
 0x142   :  { %v240_v29 = vadd.f32 %v239_v26, %v188_v27 }
 0x144   :  { %v279_v30 = vpop.f32.mrf.mxu2 }
 0x145   :  { %v280_v39 = vadd.f32 %v279_v30, %v193_v36 }
 0x149   :  { %v241_v33 = vpop.f32.mrf.mxu0 }
 0x14a   :  { %v242_v42 = vadd.f32 %v241_v33, %v193_v36 }
 0x14b   :  { %v296_v31 = vpop.f32.mrf.mxu3 }
 0x14c   :  { %v297_v32 = vadd.f32 %v296_v31, %v278_v28  ;;  %v282_v43 = vpop.f32.mrf.mxu2 }
 0x14d   :  { %v283_v49 = vadd.f32 %v282_v43, %v198_v44 }
 0x14e   :  { %v307_v34 = vmax.f32 %v297_v32, 0.0  ;;  %v258_v35 = vpop.f32.mrf.mxu1 }
 0x14f   :  { %v259_v37 = vadd.f32 %v258_v35, %v240_v29 }
 0x150   :  { %319 = vst [vmem:[#allocation5 + $0x20] sm:$0xff] %v307_v34 }
 0x151   :  { %v306_v38 = vmax.f32 %v259_v37, 0.0  ;;  %v244_v48 = vpop.f32.mrf.mxu0 }
 0x152   :  { %v245_v51 = vadd.f32 %v244_v48, %v198_v44 }
 0x153   :  { %314 = vst [vmem:[#allocation5] sm:$0xff] %v306_v38  ;;  %v298_v40 = vpop.f32.mrf.mxu3 }
 0x154   :  { %v299_v41 = vadd.f32 %v298_v40, %v280_v39  ;;  %v284_v57 = vpop.f32.mrf.mxu2 }
 0x155   :  { %v285_v61 = vadd.f32 %v284_v57, %v203_v56 }
 0x156   :  { %v309_v45 = vmax.f32 %v299_v41, 0.0  ;;  %v260_v46 = vpop.f32.mrf.mxu1 }
 0x157   :  { %v261_v47 = vadd.f32 %v260_v46, %v242_v42 }
 0x158   :  { %320 = vst [vmem:[#allocation5 + $0x28] sm:$0xff] %v309_v45 }
 0x159   :  { %v308_v50 = vmax.f32 %v261_v47, 0.0  ;;  %v246_v60 = vpop.f32.mrf.mxu0 }
 0x15a   :  { %v247_v0 = vadd.f32 %v246_v60, %v203_v56 }
 0x15b   :  { %315 = vst [vmem:[#allocation5 + $0x8] sm:$0xff] %v308_v50  ;;  %v301_v52 = vpop.f32.mrf.mxu3 }
 0x15c   :  { %v302_v53 = vadd.f32 %v301_v52, %v283_v49 }
 0x15e   :  { %v311_v54 = vmax.f32 %v302_v53, 0.0  ;;  %v263_v55 = vpop.f32.mrf.mxu1 }
 0x15f   :  { %v264_v58 = vadd.f32 %v263_v55, %v245_v51 }
 0x160   :  { %321 = vst [vmem:[#allocation5 + $0x30] sm:$0xff] %v311_v54 }
 0x161   :  { %v310_v59 = vmax.f32 %v264_v58, 0.0 }
 0x163   :  { %316 = vst [vmem:[#allocation5 + $0x10] sm:$0xff] %v310_v59  ;;  %v303_v62 = vpop.f32.mrf.mxu3 }
 0x164   :  { %v304_v63 = vadd.f32 %v303_v62, %v285_v61 }
 0x166   :  { %v313_v1 = vmax.f32 %v304_v63, 0.0  ;;  %v265_v2 = vpop.f32.mrf.mxu1 }
 0x167   :  { %v266_v3 = vadd.f32 %v265_v2, %v247_v0 }
 0x168   :  { %322 = vst [vmem:[#allocation5 + $0x38] sm:$0xff] %v313_v1 }
 0x169   :  { %v312_v4 = vmax.f32 %v266_v3, 0.0 }
 0x16b   :  { %317 = vst [vmem:[#allocation5 + $0x18] sm:$0xff] %v312_v4 }
 0x16c   :  { %335 = dma.vmem_to_hbm [thread:$0]  %s328_s2, 1024, %s330_s22, [#allocation4], %s471_s17, %s471_s17, %s472_s18  }
 0x16d   :  { %468 = dma.done.wait [#allocation4], 1024  }
 0x16e   :  { %469 = vsyncadd [#allocation4], 4294966272 }
 0x16f   :  { %340 = vsyncpa [#allocation3], 1 }
 0x170   :  { %341 = vsyncpa [#allocation4], 1 }

</bundles_post_ra>
